<compile_context>
chip_gen: v5e
topology: v5e:2x2
jax: 0.10.0
libtpu: 0.0.40
codegen_flags: <defaults>
</compile_context>

<pallas_src>
import functools

import jax
import jax.numpy as jnp
from jax.experimental import pallas as pl
from jax.experimental.pallas import tpu as pltpu


def _ukd_kernel(x_ref, t_ref, out_ref, *, c_old, alpha, tile_p, p_valid,
                apply_mask):
    """Per-pixel unbiased-KD loss for one (image, pixel-tile) grid step."""
    x = x_ref[0].astype(jnp.float32)                  # (c_in,  tile_p) student
    t = t_ref[0].astype(jnp.float32)                  # (c_old, tile_p) teacher
    if alpha != 1.0:                                  # static trace-time guard
        t = t * alpha

    c_in = x.shape[0]

    # Student logsumexp over all channels; reuse exp(x - x_max) for the
    # background logsumexp over channels {0} U {c_old .. c_in-1}.
    x_max = jnp.max(x, axis=0, keepdims=True)                        # (1, P)
    e = jnp.exp(x - x_max)                                           # (c_in, P)
    den = jnp.log(jnp.sum(e, axis=0, keepdims=True)) + x_max         # (1, P)

    ch = jax.lax.broadcasted_iota(jnp.int32, (c_in, 1), 0)           # (c_in, 1)
    is_bkg = jnp.logical_or(ch == 0, ch >= c_old)
    bkg_sum = jnp.sum(jnp.where(is_bkg, e, 0.0), axis=0, keepdims=True)
    # tiny epsilon guards log(0) when all bkg logits are >~88 below the max.
    bkg = jnp.log(bkg_sum + 1e-37) + x_max                           # (1, P)

    # Teacher soft targets: normalization is folded into one (1, P) approx
    # reciprocal (sum of softmax == 1), no (c_old, P) divide.
    t_max = jnp.max(t, axis=0, keepdims=True)
    et = jnp.exp(t - t_max)                                          # (c_old, P)
    inv_sum_et = pl.reciprocal(jnp.sum(et, axis=0, keepdims=True), approx=True)

    # x' = student logits over old classes with channel 0 replaced by bkg.
    # Full-width masked select (no sublane-offset-1 slice), one multiply +
    # one sublane reduce.
    ch_old = jax.lax.broadcasted_iota(jnp.int32, (c_old, 1), 0)      # (c_old, 1)
    xprime = jnp.where(ch_old == 0, bkg, x[:c_old, :])               # (c_old, P)
    num = jnp.sum(et * xprime, axis=0, keepdims=True)                # (1, P)

    loss = (num * inv_sum_et - den) * (1.0 / c_old)                  # (1, P)

    if apply_mask:  # only emitted when the pixel axis was padded
        pix = (pl.program_id(1) * tile_p
               + jax.lax.broadcasted_iota(jnp.int32, (1, tile_p), 1))
        loss = jnp.where(pix < p_valid, loss, 0.0)

    out_ref[...] = loss[None, :, :]


def _round_up(x, m):
    return ((x + m - 1) // m) * m


def _choose_tiling(p, max_tile):
    """Pick a lane-dense pixel tile. Returns (tile, padded_p, needs_mask)."""
    best_div = 0
    t = 128
    while t <= min(p, max_tile):
        if p % t == 0:
            best_div = t
        t += 128
    pad_tile = min(max_tile, _round_up(p, 128))
    if best_div == pad_tile or best_div >= min(512, pad_tile):
        return best_div, p, False                     # exact divisor, no mask
    return pad_tile, _round_up(p, pad_tile), True     # pad + in-kernel tail mask


def unbiased_kd_loss(inputs, targets, mask=None, *, alpha=1.0,
                     reduction="mean"):
    """inputs: (N, C_in, H, W) student logits; targets: (N, C_old, H, W) teacher.

    Pass logits in their native dtype (e.g. bf16): the kernel upcasts in VMEM,
    so lower-precision inputs simply halve HBM traffic.
    """
    N, c_in, H, W = inputs.shape
    _, c_old, th, tw = targets.shape
    assert c_in > c_old, "UKD loss expects at least one new class (C_in > C_old)"
    assert (th, tw) == (H, W)

    P = H * W
    x = inputs.reshape(N, c_in, P)        # free reshape, no transpose
    t = targets.reshape(N, c_old, P)

    # Tile budget: double-buffered pipeline blocks (native dtype) plus the live
    # f32 temporaries inside the kernel (x, e, et, xprime, products, row temps).
    in_b = jnp.dtype(inputs.dtype).itemsize
    tg_b = jnp.dtype(targets.dtype).itemsize
    per_lane_bytes = (2 * (in_b * c_in + tg_b * c_old)   # pipeline inputs x2 buf
                      + 2 * 4                            # pipeline output x2 buf
                      + 4 * (2 * c_in + 3 * c_old + 8))  # in-kernel f32 temps
    budget = 20 * 1024 * 1024             # stay well inside 32 MiB scoped VMEM
    max_tile = max(128, min(2048, (budget // per_lane_bytes) // 128 * 128))

    tile, Pp, apply_mask = _choose_tiling(P, max_tile)
    if Pp != P:
        x = jnp.pad(x, ((0, 0), (0, 0), (0, Pp - P)))
        t = jnp.pad(t, ((0, 0), (0, 0), (0, Pp - P)))
    n_tiles = Pp // tile

    kernel = functools.partial(_ukd_kernel, c_old=c_old, alpha=float(alpha),
                               tile_p=tile, p_valid=P, apply_mask=apply_mask)

    # One independent (1, 1, tile) output block per (image, pixel-tile): both
    # grid axes are "parallel" so v7x megacore splits the pixel axis too.
    partial = pl.pallas_call(
        kernel,
        out_shape=jax.ShapeDtypeStruct((N * n_tiles, 1, tile), jnp.float32),
        grid_spec=pltpu.PrefetchScalarGridSpec(
            num_scalar_prefetch=0,
            grid=(N, n_tiles),
            in_specs=[
                pl.BlockSpec((1, c_in, tile), lambda n, i: (n, 0, i)),
                pl.BlockSpec((1, c_old, tile), lambda n, i: (n, 0, i)),
            ],
            out_specs=pl.BlockSpec((1, 1, tile),
                                   lambda n, i: (n * n_tiles + i, 0, 0)),
        ),
        compiler_params=pltpu.CompilerParams(
            dimension_semantics=("parallel", "parallel")),
    )(x, t)

    if mask is None and reduction in ("mean", "sum"):
        total = jnp.sum(partial)          # padded pixels were zeroed in-kernel
    else:
        per_pixel = partial.reshape(N, Pp)[:, :P].reshape(N, H, W)
        if mask is not None:
            per_pixel = per_pixel * mask.astype(jnp.float32)
        if reduction not in ("mean", "sum"):
            return -per_pixel             # matches PyTorch's `else: -loss`
        total = jnp.sum(per_pixel)

    if reduction == "mean":
        return -total / (N * H * W)
    return -total


def _reference_loss(inputs, targets, alpha=1.0):
    """Pure-JAX reference reproducing the PyTorch forward (reduction='mean')."""
    c_in = inputs.shape[1]
    c_old = targets.shape[1]
    targets = targets * alpha
    bkg_idx = jnp.array([0] + list(range(c_old, c_in)))
    den = jax.scipy.special.logsumexp(inputs, axis=1)                  # (N,H,W)
    outputs_no_bgk = inputs[:, 1:c_old] - den[:, None]                 # (N,C_old-1,H,W)
    outputs_bkg = jax.scipy.special.logsumexp(inputs[:, bkg_idx, :, :],
                                              axis=1) - den            # (N,H,W)
    labels = jax.nn.softmax(targets, axis=1)                           # (N,C_old,H,W)
    loss = (labels[:, 0] * outputs_bkg +
            (labels[:, 1:] * outputs_no_bgk).sum(axis=1)) / c_old
    return -jnp.mean(loss)


if __name__ == "__main__":
    key = jax.random.PRNGKey(0)
    k1, k2, k3, k4 = jax.random.split(key, 4)

    # Case 1: even pixel count (exact-divisor tiling path).
    N, C_OLD, NEW_CL, H, W = 2, 4, 2, 16, 16
    C_IN = C_OLD + NEW_CL
    inputs = jax.random.normal(k1, (N, C_IN, H, W), dtype=jnp.float32)    # student
    targets = jax.random.normal(k2, (N, C_OLD, H, W), dtype=jnp.float32)  # teacher

    loss = jax.block_until_ready(
        unbiased_kd_loss(inputs, targets, alpha=1.0, reduction="mean"))
    ref = jax.block_until_ready(_reference_loss(inputs, targets, alpha=1.0))
    assert jnp.allclose(loss, ref, rtol=2e-3, atol=2e-3), (loss, ref)

    # Case 2: ragged pixel count (pad + in-kernel tail mask path).
    N2, C_OLD2, C_IN2, H2, W2 = 1, 3, 5, 9, 9
    inputs2 = jax.random.normal(k3, (N2, C_IN2, H2, W2), dtype=jnp.float32)
    targets2 = jax.random.normal(k4, (N2, C_OLD2, H2, W2), dtype=jnp.float32)

    loss2 = jax.block_until_ready(
        unbiased_kd_loss(inputs2, targets2, alpha=2.0, reduction="mean"))
    ref2 = jax.block_until_ready(_reference_loss(inputs2, targets2, alpha=2.0))
    assert jnp.allclose(loss2, ref2, rtol=2e-3, atol=2e-3), (loss2, ref2)

    print("KERNEL_OK")
</pallas_src>

<mosaic_0001>
module attributes {stable_mosaic.version = 11 : i64} {
  func.func @_ukd_kernel(%arg0: i32, %arg1: i32, %arg2: memref<1x6x256xf32, #tpu.memory_space<vmem>>, %arg3: memref<1x4x256xf32, #tpu.memory_space<vmem>>, %arg4: memref<1x1x256xf32, #tpu.memory_space<vmem>>) attributes {dimension_semantics = [#tpu.dimension_semantics<parallel>, #tpu.dimension_semantics<parallel>], iteration_bounds = array<i64: 2, 1>, scalar_prefetch = 0 : i64, scratch_operands = 0 : i64, tpu.core_type = #tpu.core_type<tc>, window_params = [{transform_indices = @transform_0, window_bounds = array<i64: 1, 6, 256>}, {transform_indices = @transform_1, window_bounds = array<i64: 1, 4, 256>}, {transform_indices = @transform_2, window_bounds = array<i64: 1, 1, 256>}]} {
    %c0 = arith.constant 0 : index
    %c0_0 = arith.constant 0 : index
    %c0_1 = arith.constant 0 : index
    %0 = vector.load %arg2[%c0, %c0_0, %c0_1] : memref<1x6x256xf32, #tpu.memory_space<vmem>>, vector<1x6x256xf32>
    %1 = vector.shape_cast %0 : vector<1x6x256xf32> to vector<6x256xf32>
    %c0_2 = arith.constant 0 : index
    %c0_3 = arith.constant 0 : index
    %c0_4 = arith.constant 0 : index
    %2 = vector.load %arg3[%c0_2, %c0_3, %c0_4] : memref<1x4x256xf32, #tpu.memory_space<vmem>>, vector<1x4x256xf32>
    %3 = vector.shape_cast %2 : vector<1x4x256xf32> to vector<4x256xf32>
    %cst = arith.constant dense<0xFF800000> : vector<256xf32>
    %4 = vector.multi_reduction <maximumf>, %1, %cst [0] : vector<6x256xf32> to vector<256xf32>
    %5 = vector.shape_cast %4 : vector<256xf32> to vector<1x256xf32>
    %6 = vector.broadcast %5 : vector<1x256xf32> to vector<6x256xf32>
    %7 = arith.subf %1, %6 : vector<6x256xf32>
    %8 = math.exp %7 : vector<6x256xf32>
    %cst_5 = arith.constant dense<0.000000e+00> : vector<256xf32>
    %9 = vector.multi_reduction <add>, %8, %cst_5 [0] : vector<6x256xf32> to vector<256xf32>
    %10 = vector.shape_cast %9 : vector<256xf32> to vector<1x256xf32>
    %11 = math.log %10 : vector<1x256xf32>
    %12 = arith.addf %11, %5 : vector<1x256xf32>
    %13 = tpu.iota {dimensions = array<i32: 0>} : vector<6x1xi32>
    %c0_i32 = arith.constant 0 : i32
    %14 = vector.broadcast %c0_i32 : i32 to vector<6x1xi32>
    %15 = arith.cmpi eq, %13, %14 : vector<6x1xi32>
    %c4_i32 = arith.constant 4 : i32
    %16 = vector.broadcast %c4_i32 : i32 to vector<6x1xi32>
    %17 = arith.cmpi sge, %13, %16 : vector<6x1xi32>
    %18 = arith.ori %15, %17 : vector<6x1xi1>
    %cst_6 = arith.constant 0.000000e+00 : f32
    %19 = vector.shape_cast %18 : vector<6x1xi1> to vector<6x1xi1>
    %20 = vector.broadcast %19 : vector<6x1xi1> to vector<6x256xi1>
    %21 = vector.broadcast %cst_6 : f32 to vector<6x256xf32>
    %22 = arith.select %20, %8, %21 : vector<6x256xi1>, vector<6x256xf32>
    %cst_7 = arith.constant dense<0.000000e+00> : vector<256xf32>
    %23 = vector.multi_reduction <add>, %22, %cst_7 [0] : vector<6x256xf32> to vector<256xf32>
    %24 = vector.shape_cast %23 : vector<256xf32> to vector<1x256xf32>
    %cst_8 = arith.constant 9.99999991E-38 : f32
    %25 = vector.broadcast %cst_8 : f32 to vector<1x256xf32>
    %26 = arith.addf %24, %25 : vector<1x256xf32>
    %27 = math.log %26 : vector<1x256xf32>
    %28 = arith.addf %27, %5 : vector<1x256xf32>
    %cst_9 = arith.constant dense<0xFF800000> : vector<256xf32>
    %29 = vector.multi_reduction <maximumf>, %3, %cst_9 [0] : vector<4x256xf32> to vector<256xf32>
    %30 = vector.shape_cast %29 : vector<256xf32> to vector<1x256xf32>
    %31 = vector.broadcast %30 : vector<1x256xf32> to vector<4x256xf32>
    %32 = arith.subf %3, %31 : vector<4x256xf32>
    %33 = math.exp %32 : vector<4x256xf32>
    %cst_10 = arith.constant dense<0.000000e+00> : vector<256xf32>
    %34 = vector.multi_reduction <add>, %33, %cst_10 [0] : vector<4x256xf32> to vector<256xf32>
    %35 = vector.shape_cast %34 : vector<256xf32> to vector<1x256xf32>
    %36 = tpu.reciprocal %35 {approx = true} : vector<1x256xf32> -> vector<1x256xf32>
    %37 = tpu.iota {dimensions = array<i32: 0>} : vector<4x1xi32>
    %c0_i32_11 = arith.constant 0 : i32
    %38 = vector.broadcast %c0_i32_11 : i32 to vector<4x1xi32>
    %39 = arith.cmpi eq, %37, %38 : vector<4x1xi32>
    %40 = vector.extract_strided_slice %1 {offsets = [0, 0], sizes = [4, 256], strides = [1, 1]} : vector<6x256xf32> to vector<4x256xf32>
    %41 = vector.shape_cast %39 : vector<4x1xi1> to vector<4x1xi1>
    %42 = vector.broadcast %41 : vector<4x1xi1> to vector<4x256xi1>
    %43 = vector.shape_cast %28 : vector<1x256xf32> to vector<1x256xf32>
    %44 = vector.broadcast %43 : vector<1x256xf32> to vector<4x256xf32>
    %45 = arith.select %42, %44, %40 : vector<4x256xi1>, vector<4x256xf32>
    %46 = arith.mulf %33, %45 : vector<4x256xf32>
    %cst_12 = arith.constant dense<0.000000e+00> : vector<256xf32>
    %47 = vector.multi_reduction <add>, %46, %cst_12 [0] : vector<4x256xf32> to vector<256xf32>
    %48 = vector.shape_cast %47 : vector<256xf32> to vector<1x256xf32>
    %49 = arith.mulf %48, %36 : vector<1x256xf32>
    %50 = arith.subf %49, %12 : vector<1x256xf32>
    %cst_13 = arith.constant 2.500000e-01 : f32
    %51 = vector.broadcast %cst_13 : f32 to vector<1x256xf32>
    %52 = arith.mulf %50, %51 : vector<1x256xf32>
    %53 = vector.shape_cast %52 : vector<1x256xf32> to vector<1x1x256xf32>
    %c0_14 = arith.constant 0 : index
    %c0_15 = arith.constant 0 : index
    %c0_16 = arith.constant 0 : index
    %54 = vector.load %arg4[%c0_14, %c0_15, %c0_16] : memref<1x1x256xf32, #tpu.memory_space<vmem>>, vector<1x1x256xf32>
    tpu.vector_store %arg4[%c0_14, %c0_15, %c0_16], %53 {strides = array<i32>} : memref<1x1x256xf32, #tpu.memory_space<vmem>>, vector<1x1x256xf32>,
    return
  }
  func.func @transform_0(%arg0: i32, %arg1: i32) -> (i32, i32, i32) {
    %c0_i32 = arith.constant 0 : i32
    %c0_i32_0 = arith.constant 0 : i32
    return %arg0, %c0_i32, %arg1 : i32, i32, i32
  }
  func.func @transform_1(%arg0: i32, %arg1: i32) -> (i32, i32, i32) {
    %c0_i32 = arith.constant 0 : i32
    %c0_i32_0 = arith.constant 0 : i32
    return %arg0, %c0_i32, %arg1 : i32, i32, i32
  }
  func.func @transform_2(%arg0: i32, %arg1: i32) -> (i32, i32, i32) {
    %c1_i32 = arith.constant 1 : i32
    %0 = arith.muli %arg0, %c1_i32 : i32
    %1 = arith.addi %0, %arg1 : i32
    %c0_i32 = arith.constant 0 : i32
    %c0_i32_0 = arith.constant 0 : i32
    %c0_i32_1 = arith.constant 0 : i32
    return %1, %c0_i32, %c0_i32_0 : i32, i32, i32
  }
}

</mosaic_0001>

<bundles_post_ra>
// kernel: tpu_custom_call.1
= control target key start
LH: loop header
LB: loop body
LE: loop exit
PB: predicated region body
PF: predicated region fallthrough
CT: control target
= control target key end

     0   :  { %7 = vsyncpa [#allocation3], 0  ;;  %s821_s0 = inlined_call_operand.vmem [shape: f32[2,6,256], index: 0, kind: input, shape index: {}]   ;;  %s822_s1 = inlined_call_operand.vmem [shape: f32[2,4,256], index: 1, kind: input, shape index: {}]   ;;  %s823_s2 = inlined_call_operand.hbm [shape: f32[2,1,256], index: 2, kind: output, shape index: {}]  }
   0x1   :  { %9 = vsyncpa [#allocation3 + $0x1], 0  ;;  %s675_s9 = smov 0   ;;  %s677_s10 = smov 0  }
   0x2   :  { %s679_s11 = smov 0   ;;  %s681_s12 = smov 0  }
   0x3   :  { %s683_s13 = smov 0   ;;  %s685_s14 = smov 0  }
   0x4 LB: > { %s491_s15 = sadd.s32 4294967295, %s658_s14   ;;  %s492_s16 = sadd.s32 4294967294, %s658_s14   ;;  %s658_s14 = sphi %s685_s14, %s15_s14   ;;  %s654_s13 = sphi %s683_s13, %s830_s13   ;;  %s650_s12 = sphi %s681_s12, %s829_s12   ;;  %s646_s11 = sphi %s679_s11, %s828_s11   ;;  %s642_s10 = sphi %s677_s10, %s827_s10   ;;  %s638_s9 = sphi %s675_s9, %s826_s9  }
   0x5   : > { %s27_s17 = sadd.s32 1, %s654_s13  ;;  %s92_s18 = sadd.s32 1, %s646_s11 }
   0x6   : > { %p29_p0 = scmp.ge.s32.totalorder %s27_s17, 2  ;;  %p102_p1 = scmp.ne.s32.totalorder %s646_s11, %s642_s10 }
   0x7   : > { %p103_p2 = scmp.eq.s32.totalorder %s491_s15, 1  ;;  %p108_p3 = scmp.ne.s32.totalorder %s642_s10, %s638_s9 }
   0x8   : > { %s832_s17 = smov (%p29_p0, %s27_s17), 0  ;;  %p109_p5 = scmp.eq.s32.totalorder %s492_s16, 1 }
   0x9   : > { %p715_p4 = por %p103_p2, %p102_p1  ;;  %s89_s20 = ssub.s32 %s654_s13, %s832_s17 }
   0xa   : > { %p495_p6 = scmp.ge.s32.totalorder %s658_s14, 1  ;;  %p90_p7 = scmp.eq.s32.totalorder %s89_s20, 0 }
   0xb   : > { %p722_p8 = por %p109_p5, %p108_p3  ;;  %p153_p9 = scmp.lt.s32.totalorder %s658_s14, 3 }
   0xc   : > { %s728_s22 = scalar_select %p90_p7, %s646_s11, %s92_s18  }
   0xd   : > { %p154_p10 = pnand %p495_p6, %p153_p9 }
   0xe   : > { %p189_p11 = scmp.lt.s32.totalorder (!%p154_p10), %s650_s12, 1  ;;  %s185_s4 = sand.u32 (!%p154_p10), 1, %s642_s10  }
   0xf   : > { %157 = sbr.rel (%p154_p10) target bundleno = 116 (0x74), region = 28  ;;  %s496_s5 = sshll.u32 (!%p154_p10), %s185_s4, 1 }
  0x10   : > { %s502_s6 = sshll.u32 (!%p154_p10), %s650_s12, 1  ;;  %s187_s16 = scalar_lea.vmem (!%p154_p10), [#allocation2], %s496_s5 }
  0x11   : > { %s394_s15 = scalar_lea.hbm (!%p154_p10), %s823_s2, %s502_s6  ;;  %s396_s18 = sshll.u32 (!%p154_p10), %s187_s16, 4  ;;  %s397_s18 = int_to_ptr.vmem [resolvable:$true] %s396_s18 }
  0x12   : > { %s398_s20 = sshll.u32 (!%p154_p10), %s394_s15, 4  ;;  %s600_s27 = scalar_lea.hbm (!%p154_p10), %s823_s2, 4  ;;  %s399_s20 = int_to_ptr.hbm [resolvable:$true] %s398_s20 }
  0x14   : > { %s190_s23 = scalar_select %p189_p11, %s650_s12, 1  ;;  %vm212_vm0 = vcmask 1045504   ;;  %vm290_vm1 = vcmask 1043456   ;;  %v253_v21 = vlaneseq  ;;  %vm374_vm5 = vcmask 1040384  }
  0x15   : > { %s383_s12 = scalar_lea.sflag [#allocation3], %s185_s4 }
  0x16   : > { %s505_s24 = sshll.u32 %s190_s23, 4  ;;  %s506_s25 = sshll.u32 %s190_s23, 3  ;;  %v757_v30 = vshrl.u32 %v253_v21, 7  ;;  %vm379_vm6 = vcmp.lt.s32.totalorder %v253_v21, 256 }
  0x17   : > { %s196_s28 = scalar_lea.vmem %s821_s0, %s505_s24  ;;  %s206_s3 = scalar_lea.vmem %s822_s1, %s506_s25 }
  0x18   : > { %v738_v0 = vld [vmem:[%s196_s28] sm:$0x3f]  ;;  %v740_v1 = vld [vmem:[%s196_s28 + $0x8] sm:$0x3f]  ;;  %vm255_vm2 = vcmp.eq.s32.totalorder %v757_v30, 0  ;;  %vm256_vm3 = vcmp.ge.s32.totalorder %v757_v30, 4 }
  0x19   : > { %v211_v2 = vld [vmem:[%s206_s3] sm:$0xff]  ;;  %v213_v3 = vsel %vm212_vm0, %v738_v0, -inf  ;;  %v220_v4 = vsel %vm212_vm0, %v740_v1, -inf  ;;  %vm257_vm4 = vmor %vm255_vm2, %vm256_vm3  ;;  %s594_s23 = sshra.s32 %s399_s20, 4  ;;  %s595_s23 = int_to_ptr.hbm [resolvable:$true] %s594_s23 }
  0x1a   : > { %285 = vst [vmem:[#allocation1] ss:$2 sm:$0xff] %v211_v2  ;;  %v214_v5 = vrot.slane %v213_v3, 4  ;;  %v221_v6 = vrot.slane %v220_v4, 4  ;;  %s596_s24 = scalar_lea.hbm %s595_s23, 2  ;;  %p601_p1 = scmp.lt.s32.totalorder %s595_s23, %s823_s2 }
  0x1b   : > { %p597_p12 = scmp.ne.s32.totalorder %s595_s23, %s596_s24  ;;  %p602_p2 = scmp.lt.s32.totalorder %s600_s27, %s596_s24 }
  0x1c   : > { %v215_v7 = vmax.f32 %v213_v3, %v214_v5  ;;  %v222_v8 = vmax.f32 %v220_v4, %v221_v6 }
  0x1d   : > { %p598_p13 = pnand %p597_p12, %p715_p4  ;;  %p603_p3 = por %p602_p2, %p601_p1 }
  0x1e   : > { %v216_v9 = vrot.slane %v215_v7, 2  ;;  %v223_v10 = vrot.slane %v222_v8, 2 }
  0x1f   : > { %p599_p0 = pneg %p598_p13 }
  0x20   : > { %v217_v11 = vmax.f32 %v215_v7, %v216_v9  ;;  %v224_v12 = vmax.f32 %v222_v8, %v223_v10 }
  0x21   : > { %v286_v13 = vld.sshfl [vmem:[#allocation1] sm:$0xff pattern:$0x75316420]  ;;  %v287_v14 = vld.sshfl [vmem:[#allocation1 + $0x8] sm:$0xff pattern:$0x75316420]  ;;  %p604_p5 = pnand %p603_p3, %p599_p0 }
  0x22   : > { %v291_v15 = vsel %vm290_vm1, %v286_v13, -inf  ;;  %v298_v16 = vsel %vm290_vm1, %v287_v14, -inf  ;;  %v218_v17 = vrot.slane %v217_v11, 1  ;;  %v225_v18 = vrot.slane %v224_v12, 1 }
  0x23   : > { %v292_v19 = vrot.slane %v291_v15, 4  ;;  %v299_v20 = vrot.slane %v298_v16, 4 }
  0x24   : > { %v748_v22 = vmax.f32 %v217_v11, %v218_v17  ;;  %v750_v23 = vmax.f32 %v224_v12, %v225_v18 }
  0x25   : > { %v293_v24 = vmax.f32 %v291_v15, %v292_v19  ;;  %v300_v25 = vmax.f32 %v298_v16, %v299_v20 }
  0x26   : > { %v227_v26 = vsub.f32 %v738_v0, %v748_v22  ;;  %v228_v27 = vsub.f32 %v740_v1, %v750_v23 }
  0x27   : > { %v294_v28 = vrot.slane %v293_v24, 2  ;;  %v301_v29 = vrot.slane %v300_v25, 2 }
  0x28   : > { %v229_v31 = vmul.f32 1.442695, %v227_v26  ;;  %v231_v32 = vmul.f32 1.442695, %v228_v27 }
  0x29   : > { %v295_v33 = vmax.f32 %v293_v24, %v294_v28  ;;  %v302_v34 = vmax.f32 %v300_v25, %v301_v29 }
  0x2a   : > { %562 = vpow2.f32 %v229_v31 }
  0x2b   : > { %v296_v35 = vrot.slane %v295_v33, 1  ;;  %v303_v36 = vrot.slane %v302_v34, 1  ;;  %564 = vpow2.f32 %v231_v32 }
  0x2d   : > { %v297_v37 = vmax.f32 %v295_v33, %v296_v35  ;;  %v304_v38 = vmax.f32 %v302_v34, %v303_v36 }
  0x2f   : > { %v307_v39 = vrot.slane %v304_v38, 4 }
  0x30   : > { %v563_v40 = vpop.eup %562 }
  0x31   : > { %v308_v41 = vsel %vm290_vm1, %v297_v37, %v307_v39  ;;  %v565_v42 = vpop.eup %564  ;;  %v260_v43 = vsel %vm257_vm4, %v563_v40, 0.0  ;;  %v233_v60 = vsel %vm212_vm0, %v563_v40, 0.0 }
  0x32   : > { %v310_v44 = vsub.f32 %v211_v2, %v308_v41  ;;  %v261_v45 = vsel %vm257_vm4, %v565_v42, 0.0  ;;  %v262_v46 = vsel %vm212_vm0, %v260_v43, 0.0  ;;  %v240_v62 = vsel %vm212_vm0, %v565_v42, 0.0 }
  0x33   : > { %v263_v47 = vrot.slane %v262_v46, 4  ;;  %v269_v48 = vsel %vm212_vm0, %v261_v45, 0.0  ;;  %v234_v3 = vrot.slane %v233_v60, 4  ;;  %v241_v5 = vrot.slane %v240_v62, 4 }
  0x34   : > { %v311_v49 = vmul.f32 1.442695, %v310_v44  ;;  %v270_v50 = vrot.slane %v269_v48, 4 }
  0x35   : > { %v264_v51 = vadd.f32 %v263_v47, %v262_v46  ;;  %v235_v8 = vadd.f32 %v234_v3, %v233_v60  ;;  %v242_v10 = vadd.f32 %v241_v5, %v240_v62 }
  0x36   : > { %566 = vpow2.f32 %v311_v49  ;;  %v271_v52 = vadd.f32 %v270_v50, %v269_v48 }
  0x37   : > { %v265_v53 = vrot.slane %v264_v51, 2  ;;  %v236_v16 = vrot.slane %v235_v8, 2  ;;  %v243_v19 = vrot.slane %v242_v10, 2 }
  0x38   : > { %v272_v54 = vrot.slane %v271_v52, 2 }
  0x39   : > { %v266_v55 = vadd.f32 %v265_v53, %v264_v51  ;;  %v237_v26 = vadd.f32 %v236_v16, %v235_v8  ;;  %v244_v31 = vadd.f32 %v243_v19, %v242_v10 }
  0x3a   : > { %v273_v56 = vadd.f32 %v272_v54, %v271_v52 }
  0x3b   : > { %v267_v58 = vrot.slane %v266_v55, 1  ;;  %v238_v35 = vrot.slane %v237_v26, 1  ;;  %v245_v38 = vrot.slane %v244_v31, 1 }
  0x3c   : > { %v567_v57 = vpop.eup %566  ;;  %v274_v59 = vrot.slane %v273_v56, 1 }
  0x3d   : > { %314 = vst [vmem:[#allocation1] ss:$2 sm:$0xff] %v567_v57  ;;  %v268_v61 = vadd.f32 %v267_v58, %v266_v55  ;;  %v239_v40 = vadd.f32 %v238_v35, %v237_v26  ;;  %v246_v42 = vadd.f32 %v245_v38, %v244_v31 }
  0x3e   : > { %v275_v63 = vadd.f32 %v274_v59, %v273_v56 }
  0x3f   : > { %v276_v2 = vadd.f32 1e-37, %v268_v61 }
  0x40   : > { %v277_v4 = vadd.f32 1e-37, %v275_v63 }
  0x41   : > { %568 = vlog2.f32 %v276_v2 }
  0x42   : > { %570 = vlog2.f32 %v277_v4 }
  0x43   : > { %572 = vlog2.f32 %v239_v40 }
  0x44   : > { %v315_v6 = vld.sshfl [vmem:[#allocation1] sm:$0xff pattern:$0x75316420]  ;;  %v316_v7 = vld.sshfl [vmem:[#allocation1 + $0x8] sm:$0xff pattern:$0x75316420]  ;;  %574 = vlog2.f32 %v246_v42 }
  0x45   : > { %v319_v9 = vsel %vm290_vm1, %v315_v6, 0.0  ;;  %v326_v11 = vsel %vm290_vm1, %v316_v7, 0.0 }
  0x46   : > { %v320_v15 = vrot.slane %v319_v9, 4  ;;  %v327_v18 = vrot.slane %v326_v11, 4 }
  0x47   : > { %v569_v12 = vpop.eup %568 }
  0x48   : > { %v571_v13 = vpop.eup %570  ;;  %v279_v14 = vmul.f32 0.6931472, %v569_v12  ;;  %v321_v25 = vadd.f32 %v320_v15, %v319_v9  ;;  %v328_v29 = vadd.f32 %v327_v18, %v326_v11 }
  0x49   : > { %v281_v17 = vmul.f32 0.6931472, %v571_v13  ;;  %v573_v50 = vpop.eup %572 }
  0x4a   : > { %v282_v20 = vadd.f32 %v279_v14, %v748_v22  ;;  %v322_v34 = vrot.slane %v321_v25, 2  ;;  %v329_v37 = vrot.slane %v328_v29, 2  ;;  %v575_v53 = vpop.eup %574  ;;  %v248_v56 = vmul.f32 0.6931472, %v573_v50 }
  0x4b   : > { %v283_v24 = vadd.f32 %v281_v17, %v750_v23 }
  0x4c   : > { %v337_v27 = vsel %vm255_vm2, %v282_v20, %v738_v0  ;;  %v323_v39 = vadd.f32 %v322_v34, %v321_v25  ;;  %v330_v41 = vadd.f32 %v329_v37, %v328_v29  ;;  %v251_v63 = vadd.f32 %v248_v56, %v748_v22 }
  0x4d   : > { %v338_v28 = vsel %vm255_vm2, %v283_v24, %v740_v1 }
  0x4e   : > { %v341_v32 = vrot.slane %v338_v28, 4  ;;  %v324_v0 = vrot.slane %v323_v39, 1  ;;  %v331_v43 = vrot.slane %v330_v41, 1 }
  0x50   : > { %v342_v33 = vsel %vm290_vm1, %v337_v27, %v341_v32  ;;  %v325_v46 = vadd.f32 %v324_v0, %v323_v39  ;;  %v332_v49 = vadd.f32 %v331_v43, %v330_v41 }
  0x51   : > { %v344_v36 = vmul.f32 %v567_v57, %v342_v33  ;;  %v250_v57 = vmul.f32 0.6931472, %v575_v53 }
  0x52   : > { %576 = vrcp.f32 %v325_v46 }
  0x53   : > { %346 = vst [vmem:[#allocation1] ss:$2 sm:$0xff] %v344_v36  ;;  %578 = vrcp.f32 %v332_v49  ;;  %v252_v2 = vadd.f32 %v250_v57, %v750_v23 }
  0x58   : > { %v577_v62 = vpop.eup %576 }
  0x59   : > { %v579_v5 = vpop.eup %578 }
  0x5a   : > { %v347_v1 = vld.sshfl [vmem:[#allocation1] sm:$0xff pattern:$0x75316420]  ;;  %v348_v30 = vld.sshfl [vmem:[#allocation1 + $0x8] sm:$0xff pattern:$0x75316420] }
  0x5b   : > { %v351_v44 = vsel %vm290_vm1, %v347_v1, 0.0  ;;  %v358_v45 = vsel %vm290_vm1, %v348_v30, 0.0 }
  0x5c   : > { %v352_v47 = vrot.slane %v351_v44, 4  ;;  %v359_v48 = vrot.slane %v358_v45, 4 }
  0x5e   : > { %v353_v51 = vadd.f32 %v352_v47, %v351_v44  ;;  %v360_v52 = vadd.f32 %v359_v48, %v358_v45 }
  0x60   : > { %v354_v54 = vrot.slane %v353_v51, 2  ;;  %v361_v55 = vrot.slane %v360_v52, 2 }
  0x62   : > { %v355_v58 = vadd.f32 %v354_v54, %v353_v51  ;;  %v362_v59 = vadd.f32 %v361_v55, %v360_v52 }
  0x64   : > { %v356_v60 = vrot.slane %v355_v58, 1  ;;  %v363_v61 = vrot.slane %v362_v59, 1 }
  0x66   : > { %v357_v3 = vadd.f32 %v356_v60, %v355_v58  ;;  %v364_v4 = vadd.f32 %v363_v61, %v362_v59 }
  0x68   : > { %v365_v6 = vmul.f32 %v577_v62, %v357_v3  ;;  %v366_v7 = vmul.f32 %v579_v5, %v364_v4 }
  0x6a   : > { %v367_v8 = vsub.f32 %v365_v6, %v251_v63  ;;  %v368_v9 = vsub.f32 %v366_v7, %v252_v2 }
  0x6c   : > { %v370_v10 = vmul.f32 0.25, %v368_v9  ;;  %v369_v22 = vmul.f32 0.25, %v367_v8 }
  0x6e   : > { %v373_v23 = vrot.slane %v370_v10, 7 }
  0x70   : > { %v375_v11 = vsel %vm374_vm5, %v369_v22, %v373_v23 }
  0x71   : > { %381 = vst.msk [vmem:[%s187_s16] sm:$0x3] %vm379_vm6, %v375_v11 }
  0x72   : > { %607 = shalt.err (!%p604_p5)
}
  0x73   : > { %507 = dma.vmem_to_hbm [thread:$0]  (%p715_p4), %s397_s18, 32, %s399_s20, %s383_s12  }
  0x74 PF: > { %p513_p6 = scmp.ge.s32.totalorder %s658_s14, 2  ;;  %s410_s30 = sand.u32 1, %s638_s9  }
  0x75   : > { %s411_s3 = scalar_lea.sflag [#allocation3], %s410_s30 }
  0x76   : > { %p510_p7 = pnand %p513_p6, %p722_p8 }
  0x78   : > { %p511_p9 = pneg %p510_p7 }
  0x7a   : > { %633 = dma.done.wait (%p511_p9), %s411_s3, 32  }
  0x7b   : > { %635 = vsyncadd (%p511_p9), %s411_s3, 4294967264  ;;  %s15_s14 = sadd.s32 1, %s658_s14   ;;  %s826_s9 = smov %s642_s10 }
  0x7c   : > { %p12_p10 = scmp.ge.s32.totalorder %s15_s14, 4   ;;  %s827_s10 = smov %s646_s11 }
  0x7d   : > { %s828_s11 = smov %s728_s22  ;;  %s829_s12 = smov %s654_s13 }
  0x7e   : > { %s830_s13 = smov %s832_s17  ;;  %14 = sbr.rel (!%p12_p10) target bundleno = 4 (0x4), region = 66 }
  0x83   :  { %417 = vsyncpa [#allocation3], 1 }
  0x84   :  { %419 = vsyncpa [#allocation3 + $0x1], 1 }

</bundles_post_ra>
